<compile_context>
chip_gen: v7x
topology: tpu7x:2x2x1
jax: 0.10.0
libtpu: 0.0.40
codegen_flags: <defaults>
</compile_context>

<pallas_src>
import functools

import jax
import jax.numpy as jnp
from jax import lax
from jax.experimental import pallas as pl
from jax.experimental.pallas import tpu as pltpu

_LANE = 128
_SUBLANE = 8


# ---------------------------------------------------------------------------
# helpers
# ---------------------------------------------------------------------------

def _round_up(v, m):
    return -(-v // m) * m


def _vmem_capacity_bytes():
    try:
        return int(pltpu.get_tpu_info().vmem_capacity_bytes)
    except Exception:
        return 64 * 1024 * 1024  # conservative default (v7x per-TensorCore)


def _pick_lane_tile(hw_pad, target):
    """Largest multiple-of-128 divisor of hw_pad that is <= target."""
    if hw_pad <= target:
        return hw_pad
    t = (target // _LANE) * _LANE
    while t >= _LANE:
        if hw_pad % t == 0:
            return t
        t -= _LANE
    return hw_pad  # unreachable when 128 | hw_pad


def _pick_rows_per_block(n, c, lane_tile, target_bytes, max_tile_bytes):
    """rows_per_block = samples_per_block * c.

    Covers whole samples, is sublane aligned (multiple of 8) unless it equals
    the full N*C extent, grows toward target_bytes (f32 tile bytes) and is
    capped by max_tile_bytes so pipelined buffers always fit in VMEM.
    """
    candidates = [s for s in range(1, n + 1)
                  if n % s == 0 and ((s * c) % _SUBLANE == 0 or s == n)]
    feasible = [s for s in candidates if s * c * lane_tile * 4 <= max_tile_bytes]
    if not feasible:
        feasible = candidates[:1]
    for s in feasible:  # ascending
        if s * c * lane_tile * 4 >= target_bytes:
            return s * c
    return feasible[-1] * c


def _apply_activation(y, activation, alpha):
    if activation == "relu":
        return jnp.maximum(y, 0)
    if activation == "leaky_relu":
        return jnp.where(y >= 0, y, alpha * y)
    if activation == "elu":
        return jnp.where(y >= 0, y, alpha * (jnp.exp(y) - 1.0))
    if activation == "identity":
        return y
    raise ValueError(f"Unknown activation: {activation}")


# ---------------------------------------------------------------------------
# fused single-pass kernel (whole x resident in VMEM)
# ---------------------------------------------------------------------------

def _abr_fused_kernel(x_ref, params_ref, o_ref, *, m, eps, unbiased_corr,
                      activation, alpha):
    x = x_ref[...].astype(jnp.float32)                       # (N, C, HW)
    inv_m = 1.0 / float(m)

    # Per-channel mean: VPU adds across samples, one cross-lane reduce.
    sum_c = jnp.sum(jnp.sum(x, axis=0), axis=-1, keepdims=True)   # (C, 1)
    mu = sum_c * inv_m

    # Exact centered variance (x is resident, so the second sweep is VMEM-only).
    diff = x - mu[None, :, :]
    var_b = jnp.sum(jnp.sum(diff * diff, axis=0), axis=-1, keepdims=True) * inv_m
    var_ub = var_b * unbiased_corr

    gamma = params_ref[:, 0:1]
    beta = params_ref[:, 1:2]
    rmean = params_ref[:, 2:3]
    rvar = params_ref[:, 3:4]

    running_std = jnp.sqrt(rvar + eps)
    r = jnp.sqrt(var_ub + eps) / running_std
    d = (mu - rmean) / running_std
    wgt = gamma * r
    bia = beta + gamma * d

    scale = wgt * lax.rsqrt(var_b + eps)                     # (C, 1)
    shift = bia - mu * scale

    y = x * scale[None, :, :] + shift[None, :, :]
    y = _apply_activation(y, activation, alpha)
    o_ref[...] = y.astype(o_ref.dtype)


# ---------------------------------------------------------------------------
# tiled pass 1: per-row (sum, sum-of-squares) of (x - pilot)
# ---------------------------------------------------------------------------

def _abr_stats_kernel(x_ref, pilot_ref, out_ref, sum_ref, sq_ref, *, lane_tile):
    j = pl.program_id(1)

    @pl.when(j == 0)
    def _():
        sum_ref[...] = jnp.zeros_like(sum_ref)
        sq_ref[...] = jnp.zeros_like(sq_ref)

    pilot = pilot_ref[...]                                   # (R, 1) f32
    # Lane-wide (R, 128) partial accumulation: pure VPU column adds in the hot
    # loop; no cross-lane XLU work until the epilogue below.
    for g in range(lane_tile // _LANE):
        blk = x_ref[:, g * _LANE:(g + 1) * _LANE].astype(jnp.float32) - pilot
        sum_ref[...] += blk
        sq_ref[...] += blk * blk

    @pl.when(j == pl.num_programs(1) - 1)
    def _():
        # Single cross-lane reduce per row block.
        out_ref[:, 0:1] = jnp.sum(sum_ref[...], axis=1, keepdims=True)
        out_ref[:, 1:2] = jnp.sum(sq_ref[...], axis=1, keepdims=True)


# ---------------------------------------------------------------------------
# tiled pass 2: elementwise apply (y = x*scale + shift, then activation)
# ---------------------------------------------------------------------------

def _abr_apply_kernel(x_ref, ss_ref, o_ref, *, activation, alpha, compute_dtype):
    scale = ss_ref[:, 0:1].astype(compute_dtype)             # (R, 1), lane bcast
    shift = ss_ref[:, 1:2].astype(compute_dtype)
    x = x_ref[...].astype(compute_dtype)                     # (R, T)
    y = _apply_activation(x * scale + shift, activation, alpha)
    o_ref[...] = y.astype(o_ref.dtype)


# ---------------------------------------------------------------------------
# wrapper
# ---------------------------------------------------------------------------

def abr_forward(x_nchw, gamma, beta, running_mean, running_var,
                eps=1e-5, activation="leaky_relu", activation_param=0.01,
                *, lane_tile_target=4096, row_block_target_bytes=4 << 20,
                force_two_pass=False):
    """ABR forward (training mode, renorm=True, momentum=0.0).

    x_nchw: (N, C, H, W); gamma/beta/running_mean/running_var: (C,).
    Running statistics are NOT updated (momentum=0 semantics).
    """
    n, c, h, w = x_nchw.shape
    hw = h * w
    m = n * hw
    out_dtype = x_nchw.dtype
    itemsize = x_nchw.dtype.itemsize
    eps = float(eps)
    alpha = float(activation_param)
    # Guard M == 1: PyTorch's unbiased var would be NaN; clamp instead.
    unbiased_corr = float(m) / float(m - 1) if m > 1 else 1.0

    f32 = jnp.float32
    gamma = gamma.astype(f32)
    beta = beta.astype(f32)
    running_mean = running_mean.astype(f32)
    running_var = running_var.astype(f32)

    vmem_cap = _vmem_capacity_bytes()
    usable = int(0.7 * vmem_cap)

    # ------------------------------------------------------------------ fused
    # Padded VMEM footprint estimate of x as a (N, C, HW) resident block.
    c_pad = _round_up(c, _SUBLANE)
    hw_lanes = _round_up(hw, _LANE)
    x_buf = n * c_pad * hw_lanes * itemsize
    o_buf = n * c_pad * hw_lanes * jnp.dtype(out_dtype).itemsize
    f32_buf = n * c_pad * hw_lanes * 4
    fused_bytes = x_buf + o_buf + 3 * f32_buf

    if not force_two_pass and fused_bytes <= usable:
        x3d = x_nchw.reshape(n, c, hw)                       # free reshape
        params = jnp.stack([gamma, beta, running_mean, running_var], axis=1)
        kernel = functools.partial(
            _abr_fused_kernel, m=m, eps=eps, unbiased_corr=unbiased_corr,
            activation=activation, alpha=alpha)
        out3d = pl.pallas_call(
            kernel,
            out_shape=jax.ShapeDtypeStruct((n, c, hw), out_dtype),
            grid=(1,),
            in_specs=[pl.BlockSpec((n, c, hw), lambda i: (0, 0, 0)),
                      pl.BlockSpec((c, 4), lambda i: (0, 0))],
            out_specs=pl.BlockSpec((n, c, hw), lambda i: (0, 0, 0)),
            compiler_params=pltpu.CompilerParams(
                dimension_semantics=("arbitrary",),
                vmem_limit_bytes=min(int(0.9 * vmem_cap),
                                     max(16 << 20, fused_bytes + (4 << 20)))),
            cost_estimate=pl.CostEstimate(
                flops=8 * n * c * hw, transcendentals=0,
                bytes_accessed=x_buf + o_buf),
        )(x3d, params)
        return out3d.reshape(n, c, h, w)

    # ---------------------------------------------------------------- 2-pass
    # Free, contiguous reshape: row i = (sample i//C, channel i%C).
    hw_pad = _round_up(hw, _LANE)
    x2d = x_nchw.reshape(n * c, hw)

    # Per-row pilot value (running_mean of the row's channel), round-tripped
    # through the input dtype so padded columns contribute exactly zero to the
    # shifted sums below.
    pilot_c = running_mean.astype(x_nchw.dtype).astype(f32)          # (C,)
    pilot_rows = jnp.tile(pilot_c, n)[:, None]                       # (N*C, 1) f32

    if hw_pad != hw:
        # Lane-dense tiles / unmasked stores for awkward H*W (e.g. 7x7, 14x14).
        pad_cols = jnp.broadcast_to(
            jnp.tile(pilot_c, n)[:, None].astype(x_nchw.dtype),
            (n * c, hw_pad - hw))
        x2d = jnp.concatenate([x2d, pad_cols], axis=1)

    lane_tile = _pick_lane_tile(hw_pad, lane_tile_target)
    max_tile_bytes = max(usable // 6, 128 * 1024)
    rows_per_block = _pick_rows_per_block(
        n, c, lane_tile, min(row_block_target_bytes, max_tile_bytes),
        max_tile_bytes)
    grid = (n * c // rows_per_block, hw_pad // lane_tile)

    tile_in = rows_per_block * lane_tile * itemsize
    tile_f32 = rows_per_block * lane_tile * 4
    tile_out = rows_per_block * lane_tile * jnp.dtype(out_dtype).itemsize
    scratch_bytes = 2 * rows_per_block * _LANE * 4
    vmem1 = min(int(0.9 * vmem_cap),
                max(16 << 20, 2 * tile_in + scratch_bytes + (4 << 20)))
    vmem2 = min(int(0.9 * vmem_cap),
                max(16 << 20, 2 * tile_in + 2 * tile_out + tile_f32 + (4 << 20)))

    # Pass 1: per-row shifted (sum, sumsq).  Row axis is megacore-parallel; the
    # lane-tile axis carries the accumulator and is last / arbitrary.
    stats_kernel = functools.partial(_abr_stats_kernel, lane_tile=lane_tile)
    row_sums = pl.pallas_call(
        stats_kernel,
        out_shape=jax.ShapeDtypeStruct((n * c, 2), jnp.float32),
        grid=grid,
        in_specs=[
            pl.BlockSpec((rows_per_block, lane_tile), lambda i, j: (i, j)),
            pl.BlockSpec((rows_per_block, 1), lambda i, j: (i, 0)),
        ],
        out_specs=pl.BlockSpec((rows_per_block, 2), lambda i, j: (i, 0)),
        scratch_shapes=[pltpu.VMEM((rows_per_block, _LANE), jnp.float32),
                        pltpu.VMEM((rows_per_block, _LANE), jnp.float32)],
        compiler_params=pltpu.CompilerParams(
            dimension_semantics=("parallel", "arbitrary"),
            vmem_limit_bytes=vmem1),
        cost_estimate=pl.CostEstimate(
            flops=4 * n * c * hw_pad, transcendentals=0,
            bytes_accessed=n * c * hw_pad * itemsize + n * c * 2 * 4),
    )(x2d, pilot_rows)

    # Tiny per-channel renorm math + per-row (scale, shift) replication in
    # plain JAX (keeps cross-sublane shuffles out of the kernels).
    per_c = row_sums.reshape(n, c, 2).sum(axis=0)                    # (C, 2)
    delta = per_c[:, 0] / m
    mu = pilot_c + delta
    var_b = jnp.maximum(per_c[:, 1] / m - delta * delta, 0.0)        # biased
    var_ub = var_b * unbiased_corr                                   # unbiased
    running_std = jnp.sqrt(running_var + eps)
    r = jnp.sqrt(var_ub + eps) / running_std
    d = (mu - running_mean) / running_std
    wgt = gamma * r
    bia = beta + gamma * d
    scale_c = wgt * lax.rsqrt(var_b + eps)
    shift_c = bia - mu * scale_c
    scale_shift = jnp.tile(jnp.stack([scale_c, shift_c], axis=1), (n, 1))  # (N*C, 2)

    compute_dtype = jnp.bfloat16 if x_nchw.dtype == jnp.bfloat16 else jnp.float32
    apply_kernel = functools.partial(
        _abr_apply_kernel, activation=activation, alpha=alpha,
        compute_dtype=compute_dtype)

    # Pass 2: fully parallel elementwise apply.
    out2d = pl.pallas_call(
        apply_kernel,
        out_shape=jax.ShapeDtypeStruct((n * c, hw_pad), out_dtype),
        grid=grid,
        in_specs=[
            pl.BlockSpec((rows_per_block, lane_tile), lambda i, j: (i, j)),
            pl.BlockSpec((rows_per_block, 2), lambda i, j: (i, 0)),
        ],
        out_specs=pl.BlockSpec((rows_per_block, lane_tile), lambda i, j: (i, j)),
        compiler_params=pltpu.CompilerParams(
            dimension_semantics=("parallel", "parallel"),
            vmem_limit_bytes=vmem2),
        cost_estimate=pl.CostEstimate(
            flops=3 * n * c * hw_pad, transcendentals=0,
            bytes_accessed=n * c * hw_pad * (itemsize
                                             + jnp.dtype(out_dtype).itemsize)),
    )(x2d, scale_shift)

    if hw_pad != hw:
        out2d = out2d[:, :hw]
    return out2d.reshape(n, c, h, w)


# ---------------------------------------------------------------------------
# pure-JAX reference (mirrors the PyTorch forward: training, renorm=True)
# ---------------------------------------------------------------------------

def abr_reference(x, gamma, beta, running_mean, running_var,
                  eps=1e-5, activation_param=0.01):
    n, c, h, w = x.shape
    xt = jnp.transpose(x, (1, 0, 2, 3)).reshape(c, -1).astype(jnp.float32)
    mu = xt.mean(axis=1)
    var_ub = xt.var(axis=1, ddof=1)
    var_b = xt.var(axis=1, ddof=0)
    running_std = jnp.sqrt(running_var + eps)
    r = jnp.sqrt(var_ub + eps) / running_std
    d = (mu - running_mean) / running_std
    wgt = gamma * r
    bia = beta + gamma * d
    xn = (x - mu[None, :, None, None]) / jnp.sqrt(var_b + eps)[None, :, None, None]
    y = xn * wgt[None, :, None, None] + bia[None, :, None, None]
    return jnp.where(y >= 0, y, activation_param * y).astype(x.dtype)


if __name__ == "__main__":
    key = jax.random.PRNGKey(0)

    def make_inputs(k, n, c, h, w):
        k_x, k_g, k_b, k_rm, k_rv = jax.random.split(k, 5)
        x = jax.random.normal(k_x, (n, c, h, w), dtype=jnp.float32) * 2.0 + 0.5
        g = 1.0 + 0.1 * jax.random.normal(k_g, (c,), dtype=jnp.float32)
        b = 0.1 * jax.random.normal(k_b, (c,), dtype=jnp.float32)
        rm = 0.2 * jax.random.normal(k_rm, (c,), dtype=jnp.float32)
        rv = 1.0 + 0.1 * jnp.abs(jax.random.normal(k_rv, (c,), dtype=jnp.float32))
        return x, g, b, rm, rv

    configs = [
        # Fused single-pass path (x resident in VMEM).
        dict(shape=(2, 4, 16, 16), kwargs={}),
        # Tiled two-pass path (forced small tiles: multi-step grid).
        dict(shape=(4, 8, 16, 16),
             kwargs=dict(force_two_pass=True, lane_tile_target=128,
                         row_block_target_bytes=1)),
        # Tiled two-pass path with H*W not a multiple of 128 (lane padding).
        dict(shape=(2, 8, 9, 9),
             kwargs=dict(force_two_pass=True, lane_tile_target=128,
                         row_block_target_bytes=1)),
    ]

    for idx, cfg in enumerate(configs):
        key, sub = jax.random.split(key)
        n, c, h, w = cfg["shape"]
        x, gamma, beta, rmean, rvar = make_inputs(sub, n, c, h, w)
        out = abr_forward(x, gamma, beta, rmean, rvar, **cfg["kwargs"])
        out = jax.block_until_ready(out)
        ref = abr_reference(x, gamma, beta, rmean, rvar)
        assert out.shape == (n, c, h, w)
        err = jnp.max(jnp.abs(out - ref))
        assert jnp.allclose(out, ref, atol=1e-4, rtol=1e-4), \
            f"config {idx}: max abs diff {err}"

    print("KERNEL_OK")
</pallas_src>

<mosaic_0001>
module attributes {stable_mosaic.version = 11 : i64} {
  func.func @_abr_fused_kernel(%arg0: i32, %arg1: memref<2x4x256xf32, #tpu.memory_space<vmem>>, %arg2: memref<4x4xf32, #tpu.memory_space<vmem>>, %arg3: memref<2x4x256xf32, #tpu.memory_space<vmem>>) attributes {dimension_semantics = [#tpu.dimension_semantics<arbitrary>], iteration_bounds = array<i64: 1>, scalar_prefetch = 0 : i64, scratch_operands = 0 : i64, tpu.core_type = #tpu.core_type<tc>, window_params = [{pipeline_mode = #tpu.pipeline_mode<synchronous>, transform_indices = @transform_0, window_bounds = array<i64: 2, 4, 256>}, {pipeline_mode = #tpu.pipeline_mode<synchronous>, transform_indices = @transform_1, window_bounds = array<i64: 4, 4>}, {pipeline_mode = #tpu.pipeline_mode<synchronous>, transform_indices = @transform_2, window_bounds = array<i64: 2, 4, 256>}]} {
    %c0 = arith.constant 0 : index
    %c0_0 = arith.constant 0 : index
    %c0_1 = arith.constant 0 : index
    %0 = vector.load %arg1[%c0, %c0_0, %c0_1] : memref<2x4x256xf32, #tpu.memory_space<vmem>>, vector<2x4x256xf32>
    %cst = arith.constant dense<0.000000e+00> : vector<4x256xf32>
    %1 = vector.multi_reduction <add>, %0, %cst [0] : vector<2x4x256xf32> to vector<4x256xf32>
    %cst_2 = arith.constant dense<0.000000e+00> : vector<4xf32>
    %2 = vector.multi_reduction <add>, %1, %cst_2 [1] : vector<4x256xf32> to vector<4xf32>
    %3 = vector.shape_cast %2 : vector<4xf32> to vector<4x1xf32>
    %cst_3 = arith.constant 0.001953125 : f32
    %4 = vector.broadcast %cst_3 : f32 to vector<4x1xf32>
    %5 = arith.mulf %3, %4 : vector<4x1xf32>
    %6 = vector.shape_cast %5 : vector<4x1xf32> to vector<1x4x1xf32>
    %7 = vector.broadcast %6 : vector<1x4x1xf32> to vector<2x4x256xf32>
    %8 = arith.subf %0, %7 : vector<2x4x256xf32>
    %9 = arith.mulf %8, %8 : vector<2x4x256xf32>
    %cst_4 = arith.constant dense<0.000000e+00> : vector<4x256xf32>
    %10 = vector.multi_reduction <add>, %9, %cst_4 [0] : vector<2x4x256xf32> to vector<4x256xf32>
    %cst_5 = arith.constant dense<0.000000e+00> : vector<4xf32>
    %11 = vector.multi_reduction <add>, %10, %cst_5 [1] : vector<4x256xf32> to vector<4xf32>
    %12 = vector.shape_cast %11 : vector<4xf32> to vector<4x1xf32>
    %cst_6 = arith.constant 0.001953125 : f32
    %13 = vector.broadcast %cst_6 : f32 to vector<4x1xf32>
    %14 = arith.mulf %12, %13 : vector<4x1xf32>
    %cst_7 = arith.constant 1.00195694 : f32
    %15 = vector.broadcast %cst_7 : f32 to vector<4x1xf32>
    %16 = arith.mulf %14, %15 : vector<4x1xf32>
    %c0_8 = arith.constant 0 : index
    %c0_9 = arith.constant 0 : index
    %17 = vector.load %arg2[%c0_8, %c0_9] : memref<4x4xf32, #tpu.memory_space<vmem>>, vector<4x1xf32>
    %c0_10 = arith.constant 0 : index
    %c1 = arith.constant 1 : index
    %18 = vector.load %arg2[%c0_10, %c1] : memref<4x4xf32, #tpu.memory_space<vmem>>, vector<4x1xf32>
    %c0_11 = arith.constant 0 : index
    %c2 = arith.constant 2 : index
    %19 = vector.load %arg2[%c0_11, %c2] : memref<4x4xf32, #tpu.memory_space<vmem>>, vector<4x1xf32>
    %c0_12 = arith.constant 0 : index
    %c3 = arith.constant 3 : index
    %20 = vector.load %arg2[%c0_12, %c3] : memref<4x4xf32, #tpu.memory_space<vmem>>, vector<4x1xf32>
    %cst_13 = arith.constant 9.99999974E-6 : f32
    %21 = vector.broadcast %cst_13 : f32 to vector<4x1xf32>
    %22 = arith.addf %20, %21 : vector<4x1xf32>
    %23 = math.sqrt %22 : vector<4x1xf32>
    %cst_14 = arith.constant 9.99999974E-6 : f32
    %24 = vector.broadcast %cst_14 : f32 to vector<4x1xf32>
    %25 = arith.addf %16, %24 : vector<4x1xf32>
    %26 = math.sqrt %25 : vector<4x1xf32>
    %27 = arith.divf %26, %23 : vector<4x1xf32>
    %28 = arith.subf %5, %19 : vector<4x1xf32>
    %29 = arith.divf %28, %23 : vector<4x1xf32>
    %30 = arith.mulf %17, %27 : vector<4x1xf32>
    %31 = arith.mulf %17, %29 : vector<4x1xf32>
    %32 = arith.addf %18, %31 : vector<4x1xf32>
    %cst_15 = arith.constant 9.99999974E-6 : f32
    %33 = vector.broadcast %cst_15 : f32 to vector<4x1xf32>
    %34 = arith.addf %14, %33 : vector<4x1xf32>
    %35 = math.rsqrt %34 : vector<4x1xf32>
    %36 = arith.mulf %30, %35 : vector<4x1xf32>
    %37 = arith.mulf %5, %36 : vector<4x1xf32>
    %38 = arith.subf %32, %37 : vector<4x1xf32>
    %39 = vector.shape_cast %36 : vector<4x1xf32> to vector<1x4x1xf32>
    %40 = vector.broadcast %39 : vector<1x4x1xf32> to vector<2x4x256xf32>
    %41 = arith.mulf %0, %40 : vector<2x4x256xf32>
    %42 = vector.shape_cast %38 : vector<4x1xf32> to vector<1x4x1xf32>
    %43 = vector.broadcast %42 : vector<1x4x1xf32> to vector<2x4x256xf32>
    %44 = arith.addf %41, %43 : vector<2x4x256xf32>
    %cst_16 = arith.constant 0.000000e+00 : f32
    %45 = vector.broadcast %cst_16 : f32 to vector<2x4x256xf32>
    %46 = arith.cmpf oge, %44, %45 : vector<2x4x256xf32>
    %cst_17 = arith.constant 0.00999999977 : f32
    %47 = vector.broadcast %cst_17 : f32 to vector<2x4x256xf32>
    %48 = arith.mulf %47, %44 : vector<2x4x256xf32>
    %49 = arith.select %46, %44, %48 : vector<2x4x256xi1>, vector<2x4x256xf32>
    %c0_18 = arith.constant 0 : index
    %c0_19 = arith.constant 0 : index
    %c0_20 = arith.constant 0 : index
    %50 = vector.load %arg3[%c0_18, %c0_19, %c0_20] : memref<2x4x256xf32, #tpu.memory_space<vmem>>, vector<2x4x256xf32>
    tpu.vector_store %arg3[%c0_18, %c0_19, %c0_20], %49 {strides = array<i32>} : memref<2x4x256xf32, #tpu.memory_space<vmem>>, vector<2x4x256xf32>,
    return
  }
  func.func @transform_0(%arg0: i32) -> (i32, i32, i32) {
    %c0_i32 = arith.constant 0 : i32
    %c0_i32_0 = arith.constant 0 : i32
    %c0_i32_1 = arith.constant 0 : i32
    %c0_i32_2 = arith.constant 0 : i32
    return %c0_i32, %c0_i32_0, %c0_i32_1 : i32, i32, i32
  }
  func.func @transform_1(%arg0: i32) -> (i32, i32) {
    %c0_i32 = arith.constant 0 : i32
    %c0_i32_0 = arith.constant 0 : i32
    %c0_i32_1 = arith.constant 0 : i32
    return %c0_i32, %c0_i32_0 : i32, i32
  }
  func.func @transform_2(%arg0: i32) -> (i32, i32, i32) {
    %c0_i32 = arith.constant 0 : i32
    %c0_i32_0 = arith.constant 0 : i32
    %c0_i32_1 = arith.constant 0 : i32
    %c0_i32_2 = arith.constant 0 : i32
    return %c0_i32, %c0_i32_0, %c0_i32_1 : i32, i32, i32
  }
}

</mosaic_0001>

<bundles_post_ra>
// kernel: tpu_custom_call.1
= control target key start
LH: loop header
LB: loop body
LE: loop exit
PB: predicated region body
PF: predicated region fallthrough
CT: control target
= control target key end

     0   :  { %7 = vsyncpa [#allocation3], 0  ;;  %s401_s0 = inlined_call_operand.hbm [shape: f32[2,4,256], index: 0, kind: input, shape index: {}]   ;;  %s402_s1 = inlined_call_operand.hbm [shape: f32[4,4], index: 1, kind: input, shape index: {}]   ;;  %s403_s2 = inlined_call_operand.hbm [shape: f32[2,4,256], index: 2, kind: output, shape index: {}]  }
   0x1   :  { %8 = vsyncpa [#allocation6], 0 }
   0x2   :  { %9 = vsyncpa [#allocation4], 0  ;;  %s294_s9 = smov [#allocation2]   ;;  %s222_s13 = scalar_lea.hbm %s401_s0, 256 }
   0x3   :  { %s15_s10 = sshll.u32 %s294_s9, 4  ;;  %p223_p0 = scmp.ne.s32.totalorder %s401_s0, %s222_s13  ;;  %s16_s10 = int_to_ptr.vmem [resolvable:$true] %s15_s10 }
   0x4   :  { %p226_p1 = scmp.lt.u32.totalorder %s222_s13, %s401_s0 }
   0x6   :  { %p228_p2 = pnand %p226_p1, %p223_p0 }
   0x8   :  { %231 = shalt.err (!%p228_p2)
}
   0x9   :  { %s232_s18 = scalar_lea.vmem %s16_s10, 256  ;;  %p237_p4 = scmp.lt.s32.totalorder %s16_s10, %s16_s10 }
   0xa   :  { %p233_p3 = scmp.ne.s32.totalorder %s16_s10, %s232_s18  ;;  %p238_p5 = scmp.lt.s32.totalorder %s232_s18, %s232_s18 }
   0xc   :  { %p239_p6 = por %p238_p5, %p237_p4 }
   0xe   :  { %p240_p7 = pnand %p239_p6, %p233_p3 }
  0x10   :  { %243 = shalt.err (!%p240_p7)
}
  0x11   :  { %s295_s19 = smov 128   ;;  %s296_s20 = smov 8  }
  0x12   :  { %21 = dma.hbm_to_vmem [thread:$0]  %s401_s0, 256, %s16_s10, [#allocation3], %s295_s19, %s295_s19, %s296_s20  }
  0x13   :  { %s297_s23 = smov [#allocation5]   ;;  %s244_s27 = scalar_lea.hbm %s402_s1, 64 }
  0x14   :  { %s28_s24 = sshll.u32 %s297_s23, 4  ;;  %p245_p8 = scmp.ne.s32.totalorder %s402_s1, %s244_s27  ;;  %s29_s24 = int_to_ptr.vmem [resolvable:$true] %s28_s24 }
  0x15   :  { %p248_p9 = scmp.lt.u32.totalorder %s244_s27, %s402_s1 }
  0x17   :  { %p250_p10 = pnand %p248_p9, %p245_p8 }
  0x19   :  { %253 = shalt.err (!%p250_p10)
}
  0x1a   :  { %s254_s4 = scalar_lea.vmem %s29_s24, 64  ;;  %p259_p12 = scmp.lt.s32.totalorder %s29_s24, %s29_s24 }
  0x1b   :  { %p255_p11 = scmp.ne.s32.totalorder %s29_s24, %s254_s4  ;;  %p260_p13 = scmp.lt.s32.totalorder %s254_s4, %s254_s4 }
  0x1d   :  { %p261_p0 = por %p260_p13, %p259_p12 }
  0x1f   :  { %p262_p1 = pnand %p261_p0, %p255_p11 }
  0x21   :  { %265 = shalt.err (!%p262_p1)
}
  0x22   :  { %31 = dma.hbm_to_vmem [thread:$0]  %s402_s1, 64, %s29_s24, [#allocation6]  }
  0x23   :  { %288 = dma.done.wait [#allocation3], 256  }
  0x24   :  { %289 = vsyncadd [#allocation3], 4294967040 }
  0x25   :  { %290 = dma.done.wait [#allocation6], 64  }
  0x26   :  { %291 = vsyncadd [#allocation6], 4294967232  ;;  %vm46_vm0 = vcmask 1043456   ;;  %v348_v0 = vld [vmem:[#allocation2] sm:$0xff]  ;;  %v350_v1 = vld [vmem:[#allocation2 + $0x8] sm:$0xff]  ;;  %s298_s1 = smov 127   ;;  %v63_v22 = vlaneseq }
  0x27   :  { %v352_v2 = vld [vmem:[#allocation5] sm:$0xf]  ;;  %v42_v3 = vcombine.high %v348_v0, %v348_v0  ;;  %v43_v4 = vcombine.high %v350_v1, %v350_v1  ;;  %v47_v5 = vsel %vm46_vm0, %v348_v0, 0.0  ;;  %v48_v6 = vsel %vm46_vm0, %v350_v1, 0.0  ;;  %s300_s6 = smov 126   ;;  %s302_s7 = smov 125  }
  0x28   :  { %v49_v7 = vadd.f32 %v48_v6, %v47_v5  ;;  %v92_v8 = vadd.f32 1e-05, %v352_v2  ;;  %v299_v20 = vmov 839922192   ;;  %v64_v24 = vshrl.u32 %v63_v22, 7  ;;  %s303_s8 = smov 1  }
  0x29   :  { %v50_v9 = vsel %vm46_vm0, %v42_v3, 0.0  ;;  %v51_v10 = vsel %vm46_vm0, %v43_v4, 0.0  ;;  %v61_v21 = vunpack.c.l.s4 %v299_v20  ;;  %v301_v54 = vmov 0   ;;  %s305_s9 = smov [#allocation7]  }
  0x2a   :  { %v52_v11 = vadd.f32 %v51_v10, %v50_v9  ;;  %v53_v12 = vsel %vm46_vm0, %v49_v7, 0.0  ;;  %212 = vrsqrt.f32 %v92_v8  ;;  %vm95_vm1 = vcmp.eq.f32.partialorder %v92_v8, inf  ;;  %207 = vset.pattern.permute.xlu1 %v301_v54  ;;  %s182_s10 = sshll.u32 %s305_s9, 4  ;;  %s183_s10 = int_to_ptr.vmem [resolvable:$true] %s182_s10 }
  0x2b   :  { %v98_v16 = vand.u32 2147483648, %v92_v8  ;;  %vm97_vm2 = vcmp.eq.f32.partialorder %v92_v8, 0.0  ;;  %v62_v23 = vunpack.c.0.s8 %v61_v21  ;;  %v304_v63 = vmov 1   ;;  %s266_s11 = scalar_lea.vmem %s183_s10, 256  ;;  %p271_p3 = scmp.lt.s32.totalorder %s183_s10, %s183_s10 }
  0x2c   :  { %v54_v13 = vsel %vm46_vm0, %v52_v11, 0.0  ;;  %209 = vset.pattern.permute.xlu0 %v304_v63  ;;  %p267_p2 = scmp.ne.s32.totalorder %s183_s10, %s266_s11  ;;  %p272_p4 = scmp.lt.s32.totalorder %s266_s11, %s266_s11 }
  0x2d   :  { %v55_v14 = vadd.f32 %v54_v13, %v53_v12  ;;  %v367_v25 = vsub.s32 %v62_v23, %v64_v24 }
  0x2e   :  { %p273_p5 = por %p272_p4, %p271_p3 }
  0x2f   :  { %56 = vadd.xlane.f32.xlu0 %v55_v14 }
  0x30   :  { %p274_p6 = pnand %p273_p5, %p267_p2 }
  0x34   :  { %v213_v15 = vpop.eup %212 }
  0x35   :  { %v94_v17 = vmul.f32 %v213_v15, %v92_v8 }
  0x37   :  { %v96_v18 = vsel %vm95_vm1, %v92_v8, %v94_v17 }
  0x38   :  { %v99_v19 = vsel %vm97_vm2, %v98_v16, %v96_v18 }
  0x39   :  { %112 = vrot.lane.b32.xlu1 %v99_v19, %s298_s1 }
  0xab   :  { %v113_v44 = vpop.permute.xlu1 %112 }
  0xac   :  { %214 = vrcp.f32 %v113_v44 }
  0xb6   :  { %v215_v46 = vpop.eup %214 }
  0xbc   :  { %v57_v26 = vpop.xlane.xlu0 %56 }
  0xbd   :  { %v58_v27 = vmul.f32 0.001953125, %v57_v26 }
  0xbf   :  { %v66_v28 = vrot.slane %v58_v27, %v367_v25  ;;  %v110_v45 = vsub.f32 %v58_v27, %v352_v2 }
  0xc1   :  { %v68_v29 = vsub.f32 %v348_v0, %v66_v28  ;;  %v69_v30 = vsub.f32 %v350_v1, %v66_v28  ;;  %v116_v47 = vmul.f32 %v215_v46, %v110_v45 }
  0xc3   :  { %v70_v31 = vmul.f32 %v68_v29, %v68_v29  ;;  %v71_v32 = vmul.f32 %v69_v30, %v69_v30 }
  0xc5   :  { %v74_v33 = vcombine.high %v70_v31, %v70_v31  ;;  %v75_v34 = vcombine.high %v71_v32, %v71_v32  ;;  %v78_v35 = vsel %vm46_vm0, %v70_v31, 0.0  ;;  %v79_v36 = vsel %vm46_vm0, %v71_v32, 0.0 }
  0xc6   :  { %v80_v37 = vadd.f32 %v79_v36, %v78_v35 }
  0xc7   :  { %v81_v38 = vsel %vm46_vm0, %v74_v33, 0.0  ;;  %v82_v39 = vsel %vm46_vm0, %v75_v34, 0.0 }
  0xc8   :  { %v83_v40 = vadd.f32 %v82_v39, %v81_v38  ;;  %v84_v41 = vsel %vm46_vm0, %v80_v37, 0.0 }
  0xca   :  { %v85_v42 = vsel %vm46_vm0, %v83_v40, 0.0 }
  0xcb   :  { %v86_v43 = vadd.f32 %v85_v42, %v84_v41 }
  0xcd   :  { %87 = vadd.xlane.f32.xlu0 %v86_v43 }
  0xe3   :  { %123 = vrot.lane.b32.xlu0 %v116_v47, %s300_s6 }
 0x15a   :  { %v88_v48 = vpop.xlane.xlu0 %87 }
 0x15b   :  { %v89_v49 = vmul.f32 0.001953125, %v88_v48 }
 0x15d   :  { %v90_v50 = vmul.f32 1.0019569, %v89_v49  ;;  %v132_v62 = vadd.f32 1e-05, %v89_v49 }
 0x15e   :  { %v124_v60 = vpop.permute.xlu0 %123 }
 0x15f   :  { %v100_v51 = vadd.f32 1e-05, %v90_v50  ;;  %v126_v61 = vmul.f32 %v124_v60, %v352_v2 }
 0x161   :  { %216 = vrsqrt.f32 %v100_v51  ;;  %vm103_vm3 = vcmp.eq.f32.partialorder %v100_v51, inf  ;;  %v106_v56 = vand.u32 2147483648, %v100_v51  ;;  %vm105_vm4 = vcmp.eq.f32.partialorder %v100_v51, 0.0 }
 0x162   :  { %218 = vrcp.f32 %v99_v19 }
 0x163   :  { %220 = vrsqrt.f32 %v132_v62 }
 0x16b   :  { %v217_v52 = vpop.eup %216 }
 0x16c   :  { %v102_v53 = vmul.f32 %v217_v52, %v100_v51  ;;  %v219_v55 = vpop.eup %218 }
 0x16d   :  { %v221_v5 = vpop.eup %220 }
 0x16e   :  { %v104_v57 = vsel %vm103_vm3, %v100_v51, %v102_v53 }
 0x16f   :  { %v107_v58 = vsel %vm105_vm4, %v106_v56, %v104_v57 }
 0x170   :  { %v109_v59 = vmul.f32 %v219_v55, %v107_v58 }
 0x172   :  { %118 = vrot.lane.b32.xlu1 %v109_v59, %s302_s7 }
 0x176   :  { %128 = vrot.lane.b32.xlu1 %v126_v61, %s303_s8 }
 0x1e4   :  { %v119_v3 = vpop.permute.xlu1 %118 }
 0x1e5   :  { %v121_v4 = vmul.f32 %v119_v3, %v352_v2 }
 0x1e7   :  { %v134_v6 = vmul.f32 %v221_v5, %v121_v4 }
 0x1e8   :  { %v129_v8 = vpop.permute.xlu1 %128 }
 0x1e9   :  { %v135_v7 = vmul.f32 %v134_v6, %v58_v27  ;;  %v131_v9 = vadd.f32 %v129_v8, %v352_v2 }
 0x1eb   :  { %137 = vrot.lane.b32.xlu1 %v135_v7, %s303_s8 }
 0x1ef   :  { %143 = vperm.xlu1 %207, %v134_v6  }
 0x1f3   :  { %208 = vset.pattern.permute.xlu1 %v304_v63 }
 0x25d   :  { %v138_v10 = vpop.permute.xlu1 %137 }
 0x25e   :  { %v140_v11 = vsub.f32 %v131_v9, %v138_v10 }
 0x260   :  { %157 = vperm.xlu1 %208, %v140_v11  }
 0x26e   :  { %v144_v12 = vpop.permute.xlu1 %143 }
 0x26f   :  { %v151_v13 = vrot.slane %v144_v12, %v367_v25 }
 0x271   :  { %v153_v15 = vmul.f32 %v151_v13, %v348_v0  ;;  %v154_v16 = vmul.f32 %v151_v13, %v350_v1 }
 0x2df   :  { %v158_v14 = vpop.permute.xlu1 %157 }
 0x2e0   :  { %v165_v17 = vrot.slane %v158_v14, %v367_v25 }
 0x2e2   :  { %v167_v18 = vadd.f32 %v165_v17, %v153_v15  ;;  %v168_v19 = vadd.f32 %v165_v17, %v154_v16 }
 0x2e4   :  { %v171_v20 = vmul.f32 0.01, %v167_v18  ;;  %v172_v21 = vmul.f32 0.01, %v168_v19  ;;  %vm169_vm5 = vcmp.ge.f32.partialorder %v167_v18, 0.0  ;;  %vm170_vm6 = vcmp.ge.f32.partialorder %v168_v19, 0.0 }
 0x2e6   :  { %v173_v2 = vsel %vm169_vm5, %v167_v18, %v171_v20  ;;  %v174_v22 = vsel %vm170_vm6, %v168_v19, %v172_v21 }
 0x2e7   :  { %175 = vst [vmem:[#allocation7] sm:$0xff] %v173_v2  ;;  %176 = vst [vmem:[#allocation7 + $0x8] sm:$0xff] %v174_v22 }
 0x2e8   :  { %277 = shalt.err (!%p274_p6)
}
 0x2e9   :  { %s278_s14 = scalar_lea.hbm %s403_s2, 256 }
 0x2ea   :  { %p279_p7 = scmp.ne.s32.totalorder %s403_s2, %s278_s14  ;;  %p282_p8 = scmp.lt.u32.totalorder %s278_s14, %s403_s2 }
 0x2ec   :  { %p284_p9 = pnand %p282_p8, %p279_p7 }
 0x2ee   :  { %287 = shalt.err (!%p284_p9)
}
 0x2ef   :  { %188 = dma.vmem_to_hbm [thread:$0]  %s183_s10, 256, %s403_s2, [#allocation4], %s295_s19, %s295_s19, %s296_s20  }
 0x2f0   :  { %292 = dma.done.wait [#allocation4], 256  }
 0x2f1   :  { %293 = vsyncadd [#allocation4], 4294967040 }
 0x2f2   :  { %192 = vsyncpa [#allocation3], 1 }
 0x2f3   :  { %193 = vsyncpa [#allocation6], 1 }
 0x2f4   :  { %194 = vsyncpa [#allocation4], 1 }

</bundles_post_ra>
